<compile_context>
chip_gen: v6e
topology: v6e:2x2x1
jax: 0.10.0
libtpu: 0.0.40
codegen_flags: <defaults>
</compile_context>

<pallas_src>
import jax
import jax.numpy as jnp
from jax.experimental import pallas as pl
from jax.experimental.pallas import tpu as pltpu


# ----------------------------------------------------------------------------- kernel
def _ffn_kernel(x_ref, w1_ref, b1_ref, w2_ref, b2_ref, o_ref, acc_ref):
    """One (i, k) grid step of out = relu(x @ W1^T + b1) @ W2^T + b2.

    x_ref : [tm, d_model]   input dtype (cast to the MXU dtype in-kernel)
    w1_ref: [d_model, kc]   bf16 (pre-transposed W1 chunk along d_ff)
    b1_ref: [1, kc]         f32
    w2_ref: [kc, d_model]   bf16 (pre-transposed W2 chunk along d_ff)
    b2_ref: [1, d_model]    f32
    o_ref : [tm, d_model]   output dtype
    acc_ref: [tm, d_model]  f32 accumulator, resident across the k (d_ff) axis
    """
    k = pl.program_id(1)

    @pl.when(k == 0)
    def _():
        # Fold the output bias into the accumulator init (frees the epilogue tail).
        acc_ref[...] = jnp.broadcast_to(b2_ref[...], acc_ref.shape)

    xb = x_ref[...].astype(w1_ref.dtype)                                # VPU cast (filler)
    h = jnp.dot(xb, w1_ref[...], preferred_element_type=jnp.float32)    # [tm, kc] on MXU
    h = jnp.maximum(h + b1_ref[...], 0.0)                               # bias + ReLU in f32
    acc_ref[...] += jnp.dot(h.astype(w2_ref.dtype), w2_ref[...],
                            preferred_element_type=jnp.float32)         # [tm, d_model]

    @pl.when(k == pl.num_programs(1) - 1)
    def _():
        o_ref[...] = acc_ref[...].astype(o_ref.dtype)


# ----------------------------------------------------------------------------- helpers
def _round_up(a, b):
    return ((a + b - 1) // b) * b


def _device_kind():
    try:
        return jax.devices()[0].device_kind.lower()
    except Exception:
        return ""


def _vmem_capacity_bytes():
    try:
        return int(pltpu.get_tpu_info().vmem_capacity_bytes)
    except Exception:
        return 64 * 2**20  # conservative (v7x-sized) fallback; safe on every generation


def _vmem_estimate(tm, kc, d_model, xbytes, wbytes, obytes):
    return (2 * tm * d_model * xbytes        # x tile (double-buffered over i)
            + 2 * tm * d_model * obytes      # out tile (double-buffered over i)
            + 2 * d_model * kc * wbytes      # W1^T chunk (double-buffered over k)
            + 2 * kc * d_model * wbytes      # W2^T chunk (double-buffered over k)
            + 2 * (kc + d_model) * 4         # biases
            + tm * d_model * 4               # f32 accumulator scratch
            + tm * kc * 4)                   # h intermediate


def _pick_tiles(m, d_ff_pad, d_model, xbytes, wbytes, obytes, tm_target, budget):
    """Pick (tm, kc) so the double-buffered working set fits `budget` bytes of VMEM."""
    # --- M tile: prefer a divisor of m (multiple of 16 for packed bf16 sublanes),
    #     avoiding a wrapper-side jnp.pad pass over the activations.
    if m <= tm_target:
        tm = max(16, _round_up(m, 16))
    else:
        tm = 0
        if m % 16 == 0:
            for t in range(tm_target, 15, -16):
                if m % t == 0:
                    tm = t
                    break
        if tm < max(256, tm_target // 2):
            tm = tm_target  # fall back to padding m up to a multiple of tm_target

    # --- d_ff chunk: largest 128-multiple that fits the budget; shrink tm if needed.
    while True:
        kc = d_ff_pad
        if d_ff_pad > 512:
            kc = 512
            for cand in (4096, 2048, 1024, 512):
                if (d_ff_pad % cand == 0
                        and _vmem_estimate(tm, cand, d_model, xbytes, wbytes, obytes) <= budget):
                    kc = cand
                    break
        if _vmem_estimate(tm, kc, d_model, xbytes, wbytes, obytes) <= budget or tm <= 128:
            return tm, kc
        tm = max(128, tm // 2)  # extreme d_model: shrink the M tile and retry


# ----------------------------------------------------------------------------- wrapper
def prepare_ffn_params(w1, b1, w2, b2, *, compute_dtype=jnp.bfloat16):
    """One-time parameter prep (call at init, NOT per forward):
       transpose to (M,K)x(K,N) layouts, cast weights to the MXU dtype, and
       zero-pad d_ff to a chunkable multiple of 512 (padded units contribute 0)."""
    d_ff, d_model = w1.shape
    d_ff_pad = d_ff if d_ff <= 512 else _round_up(d_ff, 512)

    w1t = w1.T.astype(compute_dtype)                      # [d_model, d_ff]
    w2t = w2.T.astype(compute_dtype)                      # [d_ff, d_model]
    b1r = b1.reshape(1, d_ff).astype(jnp.float32)
    b2r = b2.reshape(1, d_model).astype(jnp.float32)
    if d_ff_pad != d_ff:
        p = d_ff_pad - d_ff
        w1t = jnp.pad(w1t, ((0, 0), (0, p)))
        w2t = jnp.pad(w2t, ((0, p), (0, 0)))
        b1r = jnp.pad(b1r, ((0, 0), (0, p)))
    return {"w1t": w1t, "b1": b1r, "w2t": w2t, "b2": b2r}


def feed_forward(x, params, *, tm_target=None):
    """x: [batch, seq, d_model]; params from prepare_ffn_params."""
    w1t, b1r, w2t, b2r = params["w1t"], params["b1"], params["w2t"], params["b2"]
    batch, seq, d_model = x.shape
    d_ff_pad = w1t.shape[1]
    m = batch * seq
    out_dtype = x.dtype

    xbytes = jnp.dtype(x.dtype).itemsize
    wbytes = jnp.dtype(w1t.dtype).itemsize
    obytes = jnp.dtype(out_dtype).itemsize

    kind = _device_kind()
    vmem_cap = _vmem_capacity_bytes()
    budget = int(vmem_cap * 0.75)        # tile-sizing budget (≈48 MiB on v7x, ≈96 MiB on v5e/v6e)
    vmem_ceiling = int(vmem_cap * 0.85)  # scoped-VMEM request ceiling (Mosaic headroom)

    if tm_target is None:
        # v6e is weight-BW-bound at tm=512 for large M; v5e/v7x are already compute-bound.
        tm_target = 1024 if ("v6" in kind and m >= 2048) else 512

    tm, kc = _pick_tiles(m, d_ff_pad, d_model, xbytes, wbytes, obytes, tm_target, budget)

    # v7x megacore: make sure the "parallel" M axis has >= 2 tiles so both TCs work.
    if "v7" in kind and m <= tm and tm >= 32 and tm % 32 == 0:
        tm //= 2

    m_pad = _round_up(m, tm)
    x2d = x.reshape(m, d_model)
    if m_pad != m:
        x2d = jnp.pad(x2d, ((0, m_pad - m), (0, 0)))

    grid = (m_pad // tm, d_ff_pad // kc)

    est = _vmem_estimate(tm, kc, d_model, xbytes, wbytes, obytes)
    vmem_limit = int(min(max(int(1.5 * est), 32 * 2**20), vmem_ceiling))

    out2d = pl.pallas_call(
        _ffn_kernel,
        out_shape=jax.ShapeDtypeStruct((m_pad, d_model), out_dtype),
        grid_spec=pltpu.PrefetchScalarGridSpec(
            num_scalar_prefetch=0,
            grid=grid,
            in_specs=[
                pl.BlockSpec((tm, d_model), lambda i, k: (i, 0)),     # x tile
                pl.BlockSpec((d_model, kc), lambda i, k: (0, k)),     # W1^T chunk
                pl.BlockSpec((1, kc),       lambda i, k: (0, k)),     # b1 chunk
                pl.BlockSpec((kc, d_model), lambda i, k: (k, 0)),     # W2^T chunk
                pl.BlockSpec((1, d_model),  lambda i, k: (0, 0)),     # b2 (resident)
            ],
            out_specs=pl.BlockSpec((tm, d_model), lambda i, k: (i, 0)),
            scratch_shapes=[pltpu.VMEM((tm, d_model), jnp.float32)],
        ),
        compiler_params=pltpu.CompilerParams(
            dimension_semantics=("parallel", "arbitrary"),
            vmem_limit_bytes=vmem_limit,
        ),
    )(x2d, w1t, b1r, w2t, b2r)

    return out2d[:m].reshape(batch, seq, d_model)


# ----------------------------------------------------------------------------- reference / test
def _ref_feed_forward(x, w1, b1, w2, b2):
    h = jnp.maximum(jnp.einsum("bsd,fd->bsf", x, w1) + b1, 0.0)
    return jnp.einsum("bsf,df->bsd", h, w2) + b2


if __name__ == "__main__":
    batch, seq, d_model, d_ff = 2, 8, 32, 64

    key = jax.random.PRNGKey(0)
    kx, kw1, kb1, kw2, kb2 = jax.random.split(key, 5)

    x = jax.random.normal(kx, (batch, seq, d_model), dtype=jnp.float32)
    # PyTorch nn.Linear weight layout: W1 [d_ff, d_model], W2 [d_model, d_ff].
    w1 = jax.random.normal(kw1, (d_ff, d_model), dtype=jnp.float32) * 0.1
    b1 = jax.random.normal(kb1, (d_ff,), dtype=jnp.float32) * 0.1
    w2 = jax.random.normal(kw2, (d_model, d_ff), dtype=jnp.float32) * 0.1
    b2 = jax.random.normal(kb2, (d_model,), dtype=jnp.float32) * 0.1

    params = prepare_ffn_params(w1, b1, w2, b2)          # one-time prep (init-time)
    out = feed_forward(x, params)
    jax.block_until_ready(out)

    ref = _ref_feed_forward(x, w1, b1, w2, b2)
    assert out.shape == (batch, seq, d_model)
    # bf16 matmul operands (f32 accumulation) vs f32 reference -> loosened tolerance.
    assert jnp.allclose(out, ref, atol=5e-2, rtol=5e-2), "mismatch vs reference"

    print("KERNEL_OK")
</pallas_src>

<mosaic_0001>
module attributes {stable_mosaic.version = 11 : i64} {
  func.func @_ffn_kernel(%arg0: i32, %arg1: i32, %arg2: memref<16x32xf32, #tpu.memory_space<vmem>>, %arg3: memref<32x64xbf16, #tpu.memory_space<vmem>>, %arg4: memref<1x64xf32, #tpu.memory_space<vmem>>, %arg5: memref<64x32xbf16, #tpu.memory_space<vmem>>, %arg6: memref<1x32xf32, #tpu.memory_space<vmem>>, %arg7: memref<16x32xf32, #tpu.memory_space<vmem>>, %arg8: memref<16x32xf32, #tpu.memory_space<vmem>>) attributes {dimension_semantics = [#tpu.dimension_semantics<parallel>, #tpu.dimension_semantics<arbitrary>], iteration_bounds = array<i64: 1, 1>, scalar_prefetch = 0 : i64, scratch_operands = 1 : i64, tpu.core_type = #tpu.core_type<tc>, window_params = [{transform_indices = @transform_0, window_bounds = array<i64: 16, 32>}, {transform_indices = @transform_1, window_bounds = array<i64: 32, 64>}, {transform_indices = @transform_2, window_bounds = array<i64: 1, 64>}, {transform_indices = @transform_3, window_bounds = array<i64: 64, 32>}, {pipeline_mode = #tpu.pipeline_mode<synchronous>, transform_indices = @transform_4, window_bounds = array<i64: 1, 32>}, {transform_indices = @transform_5, window_bounds = array<i64: 16, 32>}]} {
    %c0_i32 = arith.constant 0 : i32
    %0 = arith.cmpi eq, %arg1, %c0_i32 : i32
    %1 = arith.extui %0 : i1 to i32
    %c0_i32_0 = arith.constant 0 : i32
    %2 = arith.cmpi ne, %1, %c0_i32_0 : i32
    scf.if %2 {
      %c0_16 = arith.constant 0 : index
      %c0_17 = arith.constant 0 : index
      %21 = vector.load %arg6[%c0_16, %c0_17] : memref<1x32xf32, #tpu.memory_space<vmem>>, vector<1x32xf32>
      %22 = vector.shape_cast %21 : vector<1x32xf32> to vector<1x32xf32>
      %23 = vector.broadcast %22 : vector<1x32xf32> to vector<16x32xf32>
      %c0_18 = arith.constant 0 : index
      %c0_19 = arith.constant 0 : index
      %24 = vector.load %arg8[%c0_18, %c0_19] : memref<16x32xf32, #tpu.memory_space<vmem>>, vector<16x32xf32>
      tpu.vector_store %arg8[%c0_18, %c0_19], %23 {strides = array<i32>} : memref<16x32xf32, #tpu.memory_space<vmem>>, vector<16x32xf32>,
    } else {
    }
    %c0 = arith.constant 0 : index
    %c0_1 = arith.constant 0 : index
    %3 = vector.load %arg2[%c0, %c0_1] : memref<16x32xf32, #tpu.memory_space<vmem>>, vector<16x32xf32>
    %4 = arith.truncf %3 : vector<16x32xf32> to vector<16x32xbf16>
    %c0_2 = arith.constant 0 : index
    %c0_3 = arith.constant 0 : index
    %5 = vector.load %arg3[%c0_2, %c0_3] : memref<32x64xbf16, #tpu.memory_space<vmem>>, vector<32x64xbf16>
    %cst = arith.constant dense<0.000000e+00> : vector<16x64xf32>
    %6 = tpu.matmul %4, %5, %cst {dimension_numbers = #tpu.dot_dimension_numbers<[1], [0], [0], [1], [0, 0, 1, 1], [], []>} : vector<16x32xbf16>, vector<32x64xbf16>, vector<16x64xf32> -> vector<16x64xf32>
    %c0_4 = arith.constant 0 : index
    %c0_5 = arith.constant 0 : index
    %7 = vector.load %arg4[%c0_4, %c0_5] : memref<1x64xf32, #tpu.memory_space<vmem>>, vector<1x64xf32>
    %8 = vector.broadcast %7 : vector<1x64xf32> to vector<16x64xf32>
    %9 = arith.addf %6, %8 : vector<16x64xf32>
    %cst_6 = arith.constant 0.000000e+00 : f32
    %10 = vector.broadcast %cst_6 : f32 to vector<16x64xf32>
    %11 = arith.maximumf %9, %10 : vector<16x64xf32>
    %c0_7 = arith.constant 0 : index
    %c0_8 = arith.constant 0 : index
    %12 = vector.load %arg8[%c0_7, %c0_8] : memref<16x32xf32, #tpu.memory_space<vmem>>, vector<16x32xf32>
    %13 = arith.truncf %11 : vector<16x64xf32> to vector<16x64xbf16>
    %c0_9 = arith.constant 0 : index
    %c0_10 = arith.constant 0 : index
    %14 = vector.load %arg5[%c0_9, %c0_10] : memref<64x32xbf16, #tpu.memory_space<vmem>>, vector<64x32xbf16>
    %cst_11 = arith.constant dense<0.000000e+00> : vector<16x32xf32>
    %15 = tpu.matmul %13, %14, %cst_11 {dimension_numbers = #tpu.dot_dimension_numbers<[1], [0], [0], [1], [0, 0, 1, 1], [], []>} : vector<16x64xbf16>, vector<64x32xbf16>, vector<16x32xf32> -> vector<16x32xf32>
    %16 = arith.addf %12, %15 : vector<16x32xf32>
    %c0_12 = arith.constant 0 : index
    %c0_13 = arith.constant 0 : index
    %17 = vector.load %arg8[%c0_12, %c0_13] : memref<16x32xf32, #tpu.memory_space<vmem>>, vector<16x32xf32>
    tpu.vector_store %arg8[%c0_12, %c0_13], %16 {strides = array<i32>} : memref<16x32xf32, #tpu.memory_space<vmem>>, vector<16x32xf32>,
    %c0_i32_14 = arith.constant 0 : i32
    %18 = arith.cmpi eq, %arg1, %c0_i32_14 : i32
    %19 = arith.extui %18 : i1 to i32
    %c0_i32_15 = arith.constant 0 : i32
    %20 = arith.cmpi ne, %19, %c0_i32_15 : i32
    scf.if %20 {
      %c0_16 = arith.constant 0 : index
      %c0_17 = arith.constant 0 : index
      %21 = vector.load %arg8[%c0_16, %c0_17] : memref<16x32xf32, #tpu.memory_space<vmem>>, vector<16x32xf32>
      %c0_18 = arith.constant 0 : index
      %c0_19 = arith.constant 0 : index
      %22 = vector.load %arg7[%c0_18, %c0_19] : memref<16x32xf32, #tpu.memory_space<vmem>>, vector<16x32xf32>
      tpu.vector_store %arg7[%c0_18, %c0_19], %21 {strides = array<i32>} : memref<16x32xf32, #tpu.memory_space<vmem>>, vector<16x32xf32>,
    } else {
    }
    return
  }
  func.func @transform_0(%arg0: i32, %arg1: i32) -> (i32, i32) {
    %c0_i32 = arith.constant 0 : i32
    %c0_i32_0 = arith.constant 0 : i32
    return %arg0, %c0_i32 : i32, i32
  }
  func.func @transform_1(%arg0: i32, %arg1: i32) -> (i32, i32) {
    %c0_i32 = arith.constant 0 : i32
    %c0_i32_0 = arith.constant 0 : i32
    return %c0_i32, %arg1 : i32, i32
  }
  func.func @transform_2(%arg0: i32, %arg1: i32) -> (i32, i32) {
    %c0_i32 = arith.constant 0 : i32
    %c0_i32_0 = arith.constant 0 : i32
    return %c0_i32, %arg1 : i32, i32
  }
  func.func @transform_3(%arg0: i32, %arg1: i32) -> (i32, i32) {
    %c0_i32 = arith.constant 0 : i32
    %c0_i32_0 = arith.constant 0 : i32
    return %arg1, %c0_i32 : i32, i32
  }
  func.func @transform_4(%arg0: i32, %arg1: i32) -> (i32, i32) {
    %c0_i32 = arith.constant 0 : i32
    %c0_i32_0 = arith.constant 0 : i32
    %c0_i32_1 = arith.constant 0 : i32
    return %c0_i32, %c0_i32_0 : i32, i32
  }
  func.func @transform_5(%arg0: i32, %arg1: i32) -> (i32, i32) {
    %c0_i32 = arith.constant 0 : i32
    %c0_i32_0 = arith.constant 0 : i32
    return %arg0, %c0_i32 : i32, i32
  }
}

</mosaic_0001>

<bundles_post_ra>
// kernel: tpu_custom_call.1
= control target key start
LH: loop header
LB: loop body
LE: loop exit
PB: predicated region body
PF: predicated region fallthrough
CT: control target
= control target key end

     0   :  { %v287_v1 = vmov 0.0   ;;  %vm288_vm0 = vmmov 0   ;;  %vm33_vm1 = vcmask 261120   ;;  %s362_s0 = inlined_call_operand.vmem [shape: f32[16,32], index: 0, kind: input, shape index: {}]   ;;  %s363_s1 = inlined_call_operand.vmem [shape: bf16[32,64], index: 1, kind: input, shape index: {}]   ;;  %s364_s2 = inlined_call_operand.vmem [shape: f32[1,64], index: 2, kind: input, shape index: {}]   ;;  %s365_s3 = inlined_call_operand.vmem [shape: bf16[64,32], index: 3, kind: input, shape index: {}]   ;;  %s366_s4 = inlined_call_operand.vmem [shape: f32[1,32], index: 4, kind: input, shape index: {}]   ;;  %s367_s5 = inlined_call_operand.hbm [shape: f32[16,32], index: 5, kind: output, shape index: {}]  }
   0x1   :  { %v259_v0 = vld [vmem:[%s363_s1 + $0x8] sm:$0xff]   ;;  %234 = vmatprep.subr.bf16.mxu0 %v287_v1  ;;  %v260_v2 = vld [vmem:[%s363_s1] sm:$0xff]   ;;  %242 = vmatprep.subr.bf16.mxu1 %v287_v1  ;;  %v261_v5 = vld [vmem:[%s365_s3 + $0x18] sm:$0xff]  }
   0x2   :  { %235 = vmatpush3.bf16.msra.mxu0 %v259_v0  ;;  %238 = vmatprep.mubr.msk.bf16.mxu0 %vm288_vm0, %v287_v1  ;;  %v36_v3 = vld [vmem:[%s362_s0] sm:$0xff]  ;;  %v37_v4 = vld [vmem:[%s362_s0 + $0x8] sm:$0xff] }
   0x3   :  { %236 = vmatprep.subr.bf16.mxu0 %v287_v1  ;;  %250 = vmatprep.mubr.msk.bf16.mxu1 %vm288_vm0, %v287_v1  ;;  %v38_v6 = vpack.c.bf16 %v37_v4, %v36_v3 }
   0x4   :  { %243 = vmatpush3.bf16.msra.mxu1 %v261_v5 }
   0x5   :  { %244 = vmatprep.subr.bf16.mxu1 %v287_v1 }
   0x6   :  { %237 = vmatpush3.bf16.msra.mxu0 %v260_v2 }
   0x7   :  { %10 = vsyncpa [#allocation4], 0  ;;  %v262_v7 = vld [vmem:[%s365_s3 + $0x10] sm:$0xff]   ;;  %v263_v8 = vld [vmem:[%s365_s3 + $0x8] sm:$0xff]   ;;  %vm144_vm2 = vcmask 523264  }
   0x8   :  { %245 = vmatpush3.bf16.msra.mxu1 %v262_v7  ;;  %v264_v9 = vld [vmem:[%s365_s3] sm:$0xff]  }
   0x9   :  { %239 = vmatmul.mubr.msk.bf16.vlgmr.msra.gmra.mxu0 %vm33_vm1, %v38_v6  ;;  %246 = vmatprep.subr.bf16.mxu1 %v287_v1  ;;  %v216_v10 = vld [vmem:[%s366_s4] ss:$0 sm:$0xff] }
   0xa   :  { %34 = vst.msk [vmem:[#allocation2] sm:$0xff] %vm33_vm1, %v216_v10  ;;  %35 = vst.msk [vmem:[#allocation2 + $0x8] sm:$0xff] %vm33_vm1, %v216_v10  ;;  %v217_v11 = vld [vmem:[%s364_s2] ss:$0 sm:$0xff]  ;;  %s289_s2 = smov [#allocation3]  }
   0xb   :  { %s205_s3 = sshll.u32 %s289_s2, 4  ;;  %s206_s3 = int_to_ptr.vmem [resolvable:$true] %s205_s3 }
   0xc   :  { %247 = vmatpush3.bf16.msra.mxu1 %v263_v8  ;;  %s265_s4 = scalar_lea.vmem %s206_s3, 256  ;;  %p270_p1 = scmp.lt.s32.totalorder %s206_s3, %s206_s3 }
   0xd   :  { %248 = vmatprep.subr.bf16.mxu1 %v287_v1  ;;  %p266_p0 = scmp.ne.s32.totalorder %s206_s3, %s265_s4  ;;  %p271_p2 = scmp.lt.s32.totalorder %s265_s4, %s265_s4 }
   0xf   :  { %p272_p3 = por %p271_p2, %p270_p1 }
  0x10   :  { %249 = vmatpush3.bf16.msra.mxu1 %v264_v9 }
  0x11   :  { %v109_v21 = vld [vmem:[#allocation2] sm:$0xff]  ;;  %v110_v25 = vld [vmem:[#allocation2 + $0x8] sm:$0xff]  ;;  %p273_p4 = pnand %p272_p3, %p266_p0 }
  0xc9   :  { %v100_v12 = vpop.f32.mrf.mxu0 }
  0xca   :  { %v101_v14 = vadd.f32 %v217_v11, %v100_v12 }
  0xcb   :  { %v240_v13 = vpop.f32.mrf.mxu0 }
  0xcc   :  { %v107_v18 = vmax.f32 %v101_v14, 0.0 }
  0xcd   :  { %v103_v15 = vpop.f32.mrf.mxu0 }
  0xce   :  { %v104_v16 = vadd.f32 %v217_v11, %v103_v15 }
  0xcf   :  { %v241_v17 = vpop.f32.mrf.mxu0 }
  0xd0   :  { %v108_v19 = vmax.f32 %v104_v16, 0.0 }
  0xd2   :  { %v111_v20 = vpack.c.bf16 %v108_v19, %v107_v18 }
  0xd4   :  { %251 = vmatmul.mubr.msk.bf16.vlgmr.msra.gmra.mxu1 %vm144_vm2, %v111_v20 }
 0x194   :  { %v182_v22 = vpop.f32.mrf.mxu1 }
 0x195   :  { %v189_v23 = vadd.f32 %v182_v22, %v109_v21 }
 0x196   :  { %v252_v24 = vpop.f32.mrf.mxu1 }
 0x197   :  { %191 = vst.msk [vmem:[#allocation2] sm:$0xff] %vm33_vm1, %v189_v23 }
 0x198   :  { %v185_v26 = vpop.f32.mrf.mxu1 }
 0x199   :  { %v190_v27 = vadd.f32 %v185_v26, %v110_v25 }
 0x19a   :  { %v253_v28 = vpop.f32.mrf.mxu1 }
 0x19b   :  { %192 = vst.msk [vmem:[#allocation2 + $0x8] sm:$0xff] %vm33_vm1, %v190_v27 }
 0x19e   :  { %v196_v29 = vld [vmem:[#allocation2] sm:$0xff] }
 0x19f   :  { %198 = vst.msk [vmem:[#allocation3] sm:$0xff] %vm33_vm1, %v196_v29 }
 0x1a2   :  { %v197_v30 = vld [vmem:[#allocation2 + $0x8] sm:$0xff] }
 0x1a3   :  { %199 = vst.msk [vmem:[#allocation3 + $0x8] sm:$0xff] %vm33_vm1, %v197_v30 }
 0x1a4   :  { %276 = shalt.err (!%p273_p4)
}
 0x1a5   :  { %s290_s11 = smov 128   ;;  %s291_s12 = smov 8  }
 0x1a6   :  { %211 = dma.vmem_to_hbm [thread:$0]  %s206_s3, 256, %s367_s5, [#allocation4], %s290_s11, %s290_s11, %s291_s12  }
 0x1a7   :  { %285 = dma.done.wait [#allocation4], 256  }
 0x1a8   :  { %286 = vsyncadd [#allocation4], 4294967040 }
 0x1a9   :  { %215 = vsyncpa [#allocation4], 1 }

</bundles_post_ra>
